<compile_context>
chip_gen: v6e
topology: v6e:2x2x1
jax: 0.10.0
libtpu: 0.0.40
codegen_flags: <defaults>
</compile_context>

<pallas_src>
import jax
import jax.numpy as jnp
from jax.experimental import pallas as pl
from jax.experimental.pallas import tpu as pltpu


def _round_up(a, m):
    return (a + m - 1) // m * m


def _mlp_kernel(x_ref, w1_ref, b1_ref, w2_ref, b2_ref, o_ref):
    # x arrives in its HBM dtype (f32); cast to the MXU dtype in-kernel so the
    # wrapper never pays a separate HBM pass for the cast.
    x = x_ref[...].astype(w1_ref.dtype)
    # fc1: one MXU matmul against the block-diagonal replicated weight block.
    h = jnp.dot(x, w1_ref[...], preferred_element_type=jnp.float32)
    h = jnp.maximum(h + b1_ref[...], 0.0)                    # bias + ReLU (f32 VPU)
    # fc2: second (tiny-N) MXU matmul against the block-diagonal w2 column block;
    # avoids a sparse cross-lane reduce / transpose epilogue on the XLU.
    o = jnp.dot(h.astype(w2_ref.dtype), w2_ref[...],
                preferred_element_type=jnp.float32)
    o_ref[...] = o + b2_ref[0, 0]                            # scalar bias from SMEM


def linear_influence_forward(x, w1, b1, w2, b2, *, block_b=32768,
                             matmul_dtype=jnp.float32):
    """Forward pass of LinearInfluenceNetwork: fc2(relu(fc1(x))).

    x: (B, D); w1: (D, H); b1: (H,); w2: (H, 1); b2: (1,)
    matmul_dtype: MXU operand dtype.  float32 (default) preserves nn.Linear's f32
      semantics; bfloat16 is an opt-in speedup (x stays f32 in HBM either way).
    block_b: target batch-tile size in original rows (clamped to VMEM / grid needs).
    returns: (B, 1) float32
    """
    x = x.astype(jnp.float32)                 # module does x.float(); no-op for f32
    B, D = x.shape
    H = w1.shape[1]

    # ---- Lane-pack the tiny feature dim: (B, D) -> (B/P, P*D), P = 128 // D.
    # Contiguous reshape (bitcast-level), not a transpose: x DMA is lane-dense.
    pack = 128 // D if (D <= 128 and 128 % D == 0) else 1
    B_pack = _round_up(B, pack)
    if B_pack != B:
        # TODO(synk): handle the <pack ragged tail without this wrapper-side pad copy.
        x = jnp.pad(x, ((0, B_pack - B), (0, 0)))
    Bp = B_pack // pack                       # rows after packing
    xp = x.reshape(Bp, pack * D)

    # ---- Block-diagonal replicated weights so all packed sub-rows share one matmul.
    f32 = jnp.float32
    eye_p = jnp.eye(pack, dtype=f32)
    w1_blk = jnp.einsum("pq,dc->pdqc", eye_p,
                        w1.astype(f32)).reshape(pack * D, pack * H)
    w2_blk = jnp.einsum("pq,c->pcq", eye_p,
                        w2.astype(f32).reshape(H)).reshape(pack * H, pack)
    b1_row = jnp.tile(b1.astype(f32), pack).reshape(1, pack * H)
    b2_s = b2.astype(f32).reshape(1, 1)
    w1_blk = w1_blk.astype(matmul_dtype)
    w2_blk = w2_blk.astype(matmul_dtype)

    # ---- Generation-aware VMEM budget (v5e/v6e: 128 MiB physical, v7x: 64 MiB).
    try:
        vmem_cap = int(pltpu.get_tpu_info().vmem_capacity_bytes)
    except Exception:                         # conservative fallback
        vmem_cap = 64 * 1024 * 1024
    vmem_budget = min(int(vmem_cap * 0.7), 96 * 1024 * 1024)

    wt_sz = jnp.dtype(matmul_dtype).itemsize
    lanes_x = _round_up(pack * D, 128)
    lanes_h = _round_up(pack * H, 128)
    lanes_o = _round_up(pack, 128)
    weight_bytes = 2 * (_round_up(pack * D, 8) * lanes_h * wt_sz     # w1 block
                        + _round_up(pack * H, 8) * lanes_o * wt_sz   # w2 block
                        + 8 * lanes_h * 4)                           # b1 row
    bytes_per_prow = (2 * lanes_x * 4         # x tile (f32), double-buffered
                      + 2 * lanes_o * 4       # out tile (f32), double-buffered
                      + 4 * lanes_h * 4)      # fc1 activations + cast temporaries
    headroom = 4 * 1024 * 1024
    tbp_cap = max(8, (vmem_budget - weight_bytes - headroom) // bytes_per_prow)

    # ---- Batch tile: as large as VMEM allows, but keep >= 4 grid steps for large
    # batches (pipeline prefetch depth + sharding across v7x's 2 TensorCores).
    tbp = max(1, min(int(block_b) // pack, int(tbp_cap)))
    if Bp > 2048:
        tbp = min(tbp, -(-Bp // 4))
    if tbp >= Bp:
        tbp = Bp                              # single tile: block == full extent
    else:
        tbp = max(8, (tbp // 8) * 8)          # multi-tile: 8-row aligned blocks
    num_tiles = pl.cdiv(Bp, tbp)              # partial last block handled by Pallas

    out = pl.pallas_call(
        _mlp_kernel,
        out_shape=jax.ShapeDtypeStruct((num_tiles * tbp, pack), jnp.float32),
        grid=(num_tiles,),
        in_specs=[
            pl.BlockSpec((tbp, pack * D), lambda i: (i, 0)),        # x tile (streamed)
            pl.BlockSpec((pack * D, pack * H), lambda i: (0, 0)),   # fc1 weight block
            pl.BlockSpec((1, pack * H), lambda i: (0, 0)),          # fc1 bias row
            pl.BlockSpec((pack * H, pack), lambda i: (0, 0)),       # fc2 weight block
            pl.BlockSpec(memory_space=pltpu.MemorySpace.SMEM),      # fc2 bias scalar
        ],
        out_specs=pl.BlockSpec((tbp, pack), lambda i: (i, 0)),
        compiler_params=pltpu.CompilerParams(
            dimension_semantics=("parallel",),
            vmem_limit_bytes=int(vmem_budget)),
    )(xp, w1_blk, b1_row, w2_blk, b2_s)

    # Row-major flatten restores the original row order; drop pad / boundary rows.
    return out.reshape(-1)[:B].reshape(B, 1)


def init_params(key, dim, hidden_size):
    """Deterministic init mimicking nn.Linear default (uniform +/- 1/sqrt(fan_in))."""
    k1, k2, k3, k4 = jax.random.split(key, 4)
    lim1 = 1.0 / jnp.sqrt(jnp.float32(dim))
    lim2 = 1.0 / jnp.sqrt(jnp.float32(hidden_size))
    w1 = jax.random.uniform(k1, (dim, hidden_size), jnp.float32, -lim1, lim1)
    b1 = jax.random.uniform(k2, (hidden_size,), jnp.float32, -lim1, lim1)
    w2 = jax.random.uniform(k3, (hidden_size, 1), jnp.float32, -lim2, lim2)
    b2 = jax.random.uniform(k4, (1,), jnp.float32, -lim2, lim2)
    return w1, b1, w2, b2


def _ref_forward(x, w1, b1, w2, b2, matmul_dtype=jnp.float32):
    """Pure-JAX reference mirroring the kernel's operand precision."""
    hp = jax.lax.Precision.HIGHEST
    h = jnp.dot(x.astype(matmul_dtype), w1.astype(matmul_dtype),
                preferred_element_type=jnp.float32, precision=hp) + b1[None, :]
    h = jnp.maximum(h, 0.0)
    return jnp.dot(h.astype(matmul_dtype), w2.astype(matmul_dtype),
                   preferred_element_type=jnp.float32, precision=hp) + b2[None, :]


if __name__ == "__main__":
    key = jax.random.PRNGKey(0)
    k_x, k_p, k_x2, k_p2 = jax.random.split(key, 4)

    fwd = jax.jit(linear_influence_forward,
                  static_argnames=("block_b", "matmul_dtype"))

    # Small shapes consistent with the module (dim=16, hidden=32, batch=64).
    B, DIM, HIDDEN = 64, 16, 32
    x = jax.random.normal(k_x, (B, DIM), jnp.float32)
    w1, b1, w2, b2 = init_params(k_p, DIM, HIDDEN)

    # Exact f32 path (matches the PyTorch module semantics).
    out = jax.block_until_ready(fwd(x, w1, b1, w2, b2))
    assert out.shape == (B, 1)
    ref = _ref_forward(x, w1, b1, w2, b2)
    assert jnp.allclose(out, ref, atol=1e-4, rtol=1e-4), \
        float(jnp.max(jnp.abs(out - ref)))

    # Opt-in bf16 MXU path.
    out_bf = jax.block_until_ready(fwd(x, w1, b1, w2, b2, matmul_dtype=jnp.bfloat16))
    ref_bf = _ref_forward(x, w1, b1, w2, b2, jnp.bfloat16)
    assert jnp.allclose(out_bf, ref_bf, atol=5e-3, rtol=5e-3), \
        float(jnp.max(jnp.abs(out_bf - ref_bf)))

    # Multi-tile grid, B not a multiple of 8 (pad + boundary blocks), and the
    # module's default hidden_size=100.
    B2, HIDDEN2 = 300, 100
    x2 = jax.random.normal(k_x2, (B2, DIM), jnp.float32)
    w1b, b1b, w2b, b2b = init_params(k_p2, DIM, HIDDEN2)
    out2 = jax.block_until_ready(fwd(x2, w1b, b1b, w2b, b2b, block_b=128))
    assert out2.shape == (B2, 1)
    ref2 = _ref_forward(x2, w1b, b1b, w2b, b2b)
    assert jnp.allclose(out2, ref2, atol=1e-4, rtol=1e-4), \
        float(jnp.max(jnp.abs(out2 - ref2)))

    print("KERNEL_OK")
</pallas_src>

<mosaic_0001>
module attributes {stable_mosaic.version = 11 : i64} {
  func.func @_mlp_kernel(%arg0: i32, %arg1: memref<8x128xf32, #tpu.memory_space<vmem>>, %arg2: memref<128x256xf32, #tpu.memory_space<vmem>>, %arg3: memref<1x256xf32, #tpu.memory_space<vmem>>, %arg4: memref<256x8xf32, #tpu.memory_space<vmem>>, %arg5: memref<1x1xf32, #tpu.memory_space<smem>>, %arg6: memref<8x8xf32, #tpu.memory_space<vmem>>) attributes {dimension_semantics = [#tpu.dimension_semantics<parallel>], iteration_bounds = array<i64: 1>, scalar_prefetch = 0 : i64, scratch_operands = 0 : i64, tpu.core_type = #tpu.core_type<tc>, window_params = [{transform_indices = @transform_0, window_bounds = array<i64: 8, 128>}, {pipeline_mode = #tpu.pipeline_mode<synchronous>, transform_indices = @transform_1, window_bounds = array<i64: 128, 256>}, {pipeline_mode = #tpu.pipeline_mode<synchronous>, transform_indices = @transform_2, window_bounds = array<i64: 1, 256>}, {pipeline_mode = #tpu.pipeline_mode<synchronous>, transform_indices = @transform_3, window_bounds = array<i64: 256, 8>}, {transform_indices = @transform_4, window_bounds = array<i64: 1, 1>}, {transform_indices = @transform_5, window_bounds = array<i64: 8, 8>}]} {
    %c0 = arith.constant 0 : index
    %c0_0 = arith.constant 0 : index
    %0 = vector.load %arg1[%c0, %c0_0] : memref<8x128xf32, #tpu.memory_space<vmem>>, vector<8x128xf32>
    %c0_1 = arith.constant 0 : index
    %c0_2 = arith.constant 0 : index
    %1 = vector.load %arg2[%c0_1, %c0_2] : memref<128x256xf32, #tpu.memory_space<vmem>>, vector<128x256xf32>
    %cst = arith.constant dense<0.000000e+00> : vector<8x256xf32>
    %2 = tpu.matmul %0, %1, %cst {dimension_numbers = #tpu.dot_dimension_numbers<[1], [0], [0], [1], [0, 0, 1, 1], [], []>} : vector<8x128xf32>, vector<128x256xf32>, vector<8x256xf32> -> vector<8x256xf32>
    %c0_3 = arith.constant 0 : index
    %c0_4 = arith.constant 0 : index
    %3 = vector.load %arg3[%c0_3, %c0_4] : memref<1x256xf32, #tpu.memory_space<vmem>>, vector<1x256xf32>
    %4 = vector.broadcast %3 : vector<1x256xf32> to vector<8x256xf32>
    %5 = arith.addf %2, %4 : vector<8x256xf32>
    %cst_5 = arith.constant 0.000000e+00 : f32
    %6 = vector.broadcast %cst_5 : f32 to vector<8x256xf32>
    %7 = arith.maximumf %5, %6 : vector<8x256xf32>
    %c0_6 = arith.constant 0 : index
    %c0_7 = arith.constant 0 : index
    %8 = vector.load %arg4[%c0_6, %c0_7] : memref<256x8xf32, #tpu.memory_space<vmem>>, vector<256x8xf32>
    %cst_8 = arith.constant dense<0.000000e+00> : vector<8x8xf32>
    %9 = tpu.matmul %7, %8, %cst_8 {dimension_numbers = #tpu.dot_dimension_numbers<[1], [0], [0], [1], [0, 0, 1, 1], [], []>} : vector<8x256xf32>, vector<256x8xf32>, vector<8x8xf32> -> vector<8x8xf32>
    %c0_9 = arith.constant 0 : index
    %c0_10 = arith.constant 0 : index
    %10 = memref.load %arg5[%c0_9, %c0_10] : memref<1x1xf32, #tpu.memory_space<smem>>
    %11 = vector.broadcast %10 : f32 to vector<8x8xf32>
    %12 = arith.addf %9, %11 : vector<8x8xf32>
    %c0_11 = arith.constant 0 : index
    %c0_12 = arith.constant 0 : index
    %13 = vector.load %arg6[%c0_11, %c0_12] : memref<8x8xf32, #tpu.memory_space<vmem>>, vector<8x8xf32>
    tpu.vector_store %arg6[%c0_11, %c0_12], %12 {strides = array<i32>} : memref<8x8xf32, #tpu.memory_space<vmem>>, vector<8x8xf32>,
    return
  }
  func.func @transform_0(%arg0: i32) -> (i32, i32) {
    %c0_i32 = arith.constant 0 : i32
    %c0_i32_0 = arith.constant 0 : i32
    return %arg0, %c0_i32 : i32, i32
  }
  func.func @transform_1(%arg0: i32) -> (i32, i32) {
    %c0_i32 = arith.constant 0 : i32
    %c0_i32_0 = arith.constant 0 : i32
    %c0_i32_1 = arith.constant 0 : i32
    return %c0_i32, %c0_i32_0 : i32, i32
  }
  func.func @transform_2(%arg0: i32) -> (i32, i32) {
    %c0_i32 = arith.constant 0 : i32
    %c0_i32_0 = arith.constant 0 : i32
    %c0_i32_1 = arith.constant 0 : i32
    return %c0_i32, %c0_i32_0 : i32, i32
  }
  func.func @transform_3(%arg0: i32) -> (i32, i32) {
    %c0_i32 = arith.constant 0 : i32
    %c0_i32_0 = arith.constant 0 : i32
    %c0_i32_1 = arith.constant 0 : i32
    return %c0_i32, %c0_i32_0 : i32, i32
  }
  func.func @transform_4(%arg0: i32) -> (i32, i32) {
    %c0_i32 = arith.constant 0 : i32
    %c0_i32_0 = arith.constant 0 : i32
    %c0_i32_1 = arith.constant 0 : i32
    return %c0_i32, %c0_i32_0 : i32, i32
  }
  func.func @transform_5(%arg0: i32) -> (i32, i32) {
    %c0_i32 = arith.constant 0 : i32
    %c0_i32_0 = arith.constant 0 : i32
    return %arg0, %c0_i32 : i32, i32
  }
}

</mosaic_0001>

<bundles_post_ra>
// kernel: tile.8
= control target key start
LH: loop header
LB: loop body
LE: loop exit
PB: predicated region body
PF: predicated region fallthrough
CT: control target
= control target key end

     0   :  { %s22_s0 = inlined_call_operand.vmem [shape: f32[32], index: 0, kind: input, shape index: {}]   ;;  %s23_s1 = inlined_call_operand.vmem [shape: f32[8,32], index: 1, kind: output, shape index: {}]  }
   0x1   :  { %v4_v0 = vld [vmem:[%s22_s0] ss:$0 sm:$0xff] }
   0x2   :  { %5 = vst [vmem:[%s23_s1] sm:$0xff] %v4_v0 }

// kernel: tile.9
= control target key start
LH: loop header
LB: loop body
LE: loop exit
PB: predicated region body
PF: predicated region fallthrough
CT: control target
= control target key end

     0   :  { %s7_s6 = smov 3  ;;  %s14_s9 = smov 3  ;;  %vm4_vm0 = vcmask 261120   ;;  %vm11_vm1 = vcmask 1048320   ;;  %vm18_vm2 = vcmask 785920   ;;  %vm25_vm3 = vcmask 523520   ;;  %s79_s0 = inlined_call_operand.vmem [shape: f32[8,32], index: 0, kind: input, shape index: {}]   ;;  %s80_s1 = inlined_call_operand.vmem [shape: f32[1,256], index: 1, kind: output, shape index: {}]  }
   0x1   :  { %v41_v0 = vld [vmem:[%s79_s0 + $0x3] ss:$4 sm:%s7_s6]   ;;  %s48_s10 = smov 96   ;;  %s21_s11 = smov 3  ;;  %v42_v1 = vld [vmem:[%s79_s0 + $0x2] ss:$4 sm:%s14_s9]  }
   0x2   :  { %9 = vrot.lane.b32.xlu0 %v41_v0, %s48_s10  ;;  %v43_v2 = vld [vmem:[%s79_s0 + $0x1] ss:$4 sm:%s21_s11]   ;;  %s2_s16 = smov 3  ;;  %s49_s17 = smov 32  }
   0x3   :  { %23 = vrot.lane.b32.xlu1 %v43_v2, %s49_s17  ;;  %v3_v3 = vld [vmem:[%s79_s0] ss:$4 sm:%s2_s16]   ;;  %s50_s0 = smov 64  }
   0x4   :  { %5 = vst.msk [vmem:[#allocation0] ss:$8 sm:$0x3] %vm4_vm0, %v3_v3  }
   0x6   :  { %16 = vrot.lane.b32.xlu0 %v42_v1, %s50_s0 }
  0x74   :  { %v10_v4 = vpop.permute.xlu0 %9  }
  0x75   :  { %12 = vst.msk [vmem:[#allocation0] ss:$8 sm:$0x3] %vm11_vm1, %v10_v4   ;;  %v24_v5 = vpop.permute.xlu1 %23  }
  0x78   :  { %v17_v6 = vpop.permute.xlu0 %16  }
  0x79   :  { %19 = vst.msk [vmem:[#allocation0] ss:$8 sm:$0x3] %vm18_vm2, %v17_v6  }
  0x7a   :  { %26 = vst.msk [vmem:[#allocation0] ss:$8 sm:$0x3] %vm25_vm3, %v24_v5  }
  0x81   :  { %v31_v7 = vld [vmem:[#allocation0] sm:$0x1]  ;;  %v36_v8 = vld [vmem:[#allocation0 + $0x8] sm:$0x1] }
  0x82   :  { %34 = vst [vmem:[%s80_s1] sm:$0x1] %v31_v7  ;;  %44 = vst [vmem:[%s80_s1 + $0x1] sm:$0x1] %v36_v8 }

// kernel: linear_influence_forward.1
= control target key start
LH: loop header
LB: loop body
LE: loop exit
PB: predicated region body
PF: predicated region fallthrough
CT: control target
= control target key end

     0   :  { %v285_v3 = vmov 0.0   ;;  %vm243_vm0 = vcmask 64512   ;;  %s520_s1 = inlined_call_operand.vmem [shape: f32[128,256], index: 1, kind: input, shape index: {}]   ;;  %s521_s3 = inlined_call_operand.vmem [shape: f32[256,8], index: 3, kind: input, shape index: {}]   ;;  %s522_s0 = inlined_call_operand.vmem [shape: f32[8,128], index: 0, kind: input, shape index: {}]   ;;  %s523_s2 = inlined_call_operand.vmem [shape: f32[1,256], index: 2, kind: input, shape index: {}]   ;;  %s524_s4 = inlined_call_operand.<no memory space> [shape: f32[1,1], index: 4, kind: input, shape index: {}]   ;;  %s525_s5 = inlined_call_operand.vmem [shape: f32[8,8], index: 5, kind: output, shape index: {}]  }
   0x1   :  { %v53_v0 = vld [vmem:[%s520_s1 + $0xf8] sm:$0xff]  ;;  %v52_v1 = vld [vmem:[%s520_s1 + $0xf0] sm:$0xff]  ;;  %v51_v2 = vld [vmem:[%s520_s1 + $0xe8] sm:$0xff]  ;;  %130 = vmatprep.mubr.f32.mxu0 %v285_v3 }
   0x2   :  { %66 = vmatprep.subr.mxu0 %v53_v0  ;;  %v50_v4 = vld [vmem:[%s520_s1 + $0xe0] sm:$0xff]  ;;  %v49_v5 = vld [vmem:[%s520_s1 + $0xd8] sm:$0xff]  ;;  %v48_v6 = vld [vmem:[%s520_s1 + $0xd0] sm:$0xff] }
   0x3   :  { %67 = vmatpush1.msra.mxu0 %v52_v1  ;;  %v47_v7 = vld [vmem:[%s520_s1 + $0xc8] sm:$0xff]  ;;  %v46_v8 = vld [vmem:[%s520_s1 + $0xc0] sm:$0xff]  ;;  %v45_v9 = vld [vmem:[%s520_s1 + $0xb8] sm:$0xff] }
   0x4   :  { %68 = vmatprep.subr.mxu0 %v51_v2  ;;  %v44_v10 = vld [vmem:[%s520_s1 + $0xb0] sm:$0xff]  ;;  %v43_v11 = vld [vmem:[%s520_s1 + $0xa8] sm:$0xff]  ;;  %v42_v12 = vld [vmem:[%s520_s1 + $0xa0] sm:$0xff]  ;;  %v56_v2 = vlaneseq }
   0x5   :  { %69 = vmatpush1.msra.mxu0 %v50_v4  ;;  %v41_v13 = vld [vmem:[%s520_s1 + $0x98] sm:$0xff]  ;;  %v40_v14 = vld [vmem:[%s520_s1 + $0x90] sm:$0xff]  ;;  %v39_v18 = vld [vmem:[%s520_s1 + $0x88] sm:$0xff] }
   0x6   :  { %70 = vmatprep.subr.mxu0 %v49_v5  ;;  %v170_v15 = vld [vmem:[%s521_s3 + $0xf8] sm:$0xff]  ;;  %v169_v17 = vld [vmem:[%s521_s3 + $0xf0] sm:$0xff]  ;;  %v38_v20 = vld [vmem:[%s520_s1 + $0x80] sm:$0xff]  ;;  %v57_v3 = vshrl.u32 %v56_v2, 7 }
   0x7   :  { %71 = vmatpush1.msra.mxu0 %v48_v6  ;;  %v154_v16 = vld [vmem:[%s521_s3 + $0x78] sm:$0xff]  ;;  %249 = vmatprep.subr.mxu1 %v170_v15  ;;  %v153_v19 = vld [vmem:[%s521_s3 + $0x70] sm:$0xff]  ;;  %v168_v21 = vld [vmem:[%s521_s3 + $0xe8] sm:$0xff] }
   0x8   :  { %72 = vmatprep.subr.mxu0 %v47_v7  ;;  %250 = vmatpush3.msra.mxu1 %v154_v16  ;;  %v37_v22 = vld [vmem:[%s520_s1 + $0x78] sm:$0xff]  ;;  %v152_v23 = vld [vmem:[%s521_s3 + $0x68] sm:$0xff]  ;;  %v36_v24 = vld [vmem:[%s520_s1 + $0x70] sm:$0xff]  ;;  %v58_v4 = vsub.s32 0, %v57_v3  ;;  %v62_v6 = vsub.s32 1, %v57_v3  ;;  %v172_v16 = vstv %s524_s4 }
   0x9   :  { %73 = vmatpush1.msra.mxu0 %v46_v8  ;;  %251 = vmatprep.subr.mxu1 %v169_v17  ;;  %v167_v25 = vld [vmem:[%s521_s3 + $0xe0] sm:$0xff]  ;;  %v35_v26 = vld [vmem:[%s520_s1 + $0x68] sm:$0xff]  ;;  %v166_v29 = vld [vmem:[%s521_s3 + $0xd8] sm:$0xff] }
   0xa   :  { %74 = vmatprep.subr.mxu0 %v45_v9  ;;  %252 = vmatpush3.msra.mxu1 %v153_v19  ;;  %v151_v27 = vld [vmem:[%s521_s3 + $0x60] sm:$0xff]  ;;  %v33_v30 = vld [vmem:[%s520_s1 + $0x58] sm:$0xff]  ;;  %v32_v32 = vld [vmem:[%s520_s1 + $0x50] sm:$0xff] }
   0xb   :  { %75 = vmatpush1.msra.mxu0 %v44_v10  ;;  %253 = vmatprep.subr.mxu1 %v168_v21  ;;  %v34_v28 = vld [vmem:[%s520_s1 + $0x60] sm:$0xff]  ;;  %v150_v31 = vld [vmem:[%s521_s3 + $0x58] sm:$0xff]  ;;  %v165_v33 = vld [vmem:[%s521_s3 + $0xd0] sm:$0xff] }
   0xc   :  { %76 = vmatprep.subr.mxu0 %v43_v11  ;;  %254 = vmatpush3.msra.mxu1 %v152_v23  ;;  %v31_v34 = vld [vmem:[%s520_s1 + $0x48] sm:$0xff]  ;;  %v149_v35 = vld [vmem:[%s521_s3 + $0x50] sm:$0xff]  ;;  %v30_v36 = vld [vmem:[%s520_s1 + $0x40] sm:$0xff] }
   0xd   :  { %77 = vmatpush1.msra.mxu0 %v42_v12  ;;  %255 = vmatprep.subr.mxu1 %v167_v25  ;;  %v164_v37 = vld [vmem:[%s521_s3 + $0xc8] sm:$0xff]  ;;  %v29_v38 = vld [vmem:[%s520_s1 + $0x38] sm:$0xff]  ;;  %v28_v40 = vld [vmem:[%s520_s1 + $0x30] sm:$0xff] }
   0xe   :  { %78 = vmatprep.subr.mxu0 %v41_v13  ;;  %256 = vmatpush3.msra.mxu1 %v151_v27  ;;  %v148_v39 = vld [vmem:[%s521_s3 + $0x48] sm:$0xff]  ;;  %v163_v41 = vld [vmem:[%s521_s3 + $0xc0] sm:$0xff]  ;;  %v162_v45 = vld [vmem:[%s521_s3 + $0xb8] sm:$0xff] }
   0xf   :  { %79 = vmatpush1.msra.mxu0 %v40_v14  ;;  %257 = vmatprep.subr.mxu1 %v166_v29  ;;  %v27_v42 = vld [vmem:[%s520_s1 + $0x28] sm:$0xff]  ;;  %v147_v43 = vld [vmem:[%s521_s3 + $0x40] sm:$0xff]  ;;  %v25_v46 = vld [vmem:[%s520_s1 + $0x18] sm:$0xff] }
  0x10   :  { %80 = vmatprep.subr.mxu0 %v39_v18  ;;  %258 = vmatpush3.msra.mxu1 %v150_v31  ;;  %v26_v44 = vld [vmem:[%s520_s1 + $0x20] sm:$0xff]  ;;  %v146_v47 = vld [vmem:[%s521_s3 + $0x38] sm:$0xff]  ;;  %v24_v48 = vld [vmem:[%s520_s1 + $0x10] sm:$0xff] }
  0x11   :  { %81 = vmatpush1.msra.mxu0 %v38_v20  ;;  %259 = vmatprep.subr.mxu1 %v165_v33  ;;  %v161_v49 = vld [vmem:[%s521_s3 + $0xb0] sm:$0xff]  ;;  %v23_v50 = vld [vmem:[%s520_s1 + $0x8] sm:$0xff]  ;;  %v22_v52 = vld [vmem:[%s520_s1] sm:$0xff] }
  0x12   :  { %82 = vmatprep.subr.mxu0 %v37_v22  ;;  %260 = vmatpush3.msra.mxu1 %v149_v35  ;;  %v145_v51 = vld [vmem:[%s521_s3 + $0x30] sm:$0xff]  ;;  %v160_v53 = vld [vmem:[%s521_s3 + $0xa8] sm:$0xff]  ;;  %v21_v54 = vld [vmem:[%s522_s0] sm:$0xff] }
  0x13   :  { %83 = vmatpush1.msra.mxu0 %v36_v24  ;;  %261 = vmatprep.subr.mxu1 %v164_v37  ;;  %v144_v55 = vld [vmem:[%s521_s3 + $0x28] sm:$0xff]  ;;  %v159_v56 = vld [vmem:[%s521_s3 + $0xa0] sm:$0xff]  ;;  %v158_v58 = vld [vmem:[%s521_s3 + $0x98] sm:$0xff] }
  0x14   :  { %84 = vmatprep.subr.mxu0 %v35_v26  ;;  %262 = vmatpush3.msra.mxu1 %v148_v39  ;;  %v143_v57 = vld [vmem:[%s521_s3 + $0x20] sm:$0xff]  ;;  %v142_v59 = vld [vmem:[%s521_s3 + $0x18] sm:$0xff]  ;;  %v157_v60 = vld [vmem:[%s521_s3 + $0x90] sm:$0xff] }
  0x15   :  { %85 = vmatpush1.msra.mxu0 %v34_v28  ;;  %263 = vmatprep.subr.mxu1 %v163_v41  ;;  %v141_v61 = vld [vmem:[%s521_s3 + $0x10] sm:$0xff]  ;;  %v156_v62 = vld [vmem:[%s521_s3 + $0x88] sm:$0xff]  ;;  %v155_v0 = vld [vmem:[%s521_s3 + $0x80] sm:$0xff] }
  0x16   :  { %86 = vmatprep.subr.mxu0 %v33_v30  ;;  %264 = vmatpush3.msra.mxu1 %v147_v43  ;;  %v140_v63 = vld [vmem:[%s521_s3 + $0x8] sm:$0xff]  ;;  %v139_v1 = vld [vmem:[%s521_s3] sm:$0xff] }
  0x17   :  { %87 = vmatpush1.msra.mxu0 %v32_v32  ;;  %265 = vmatprep.subr.mxu1 %v162_v45  ;;  %v54_v5 = vld [vmem:[%s523_s2] sm:$0x3] }
  0x18   :  { %88 = vmatprep.subr.mxu0 %v31_v34  ;;  %266 = vmatpush3.msra.mxu1 %v146_v47  ;;  %v59_v7 = vrot.slane %v54_v5, %v58_v4  ;;  %v63_v8 = vrot.slane %v54_v5, %v62_v6 }
  0x19   :  { %89 = vmatpush1.msra.mxu0 %v30_v36  ;;  %267 = vmatprep.subr.mxu1 %v161_v49 }
  0x1a   :  { %90 = vmatprep.subr.mxu0 %v29_v38  ;;  %268 = vmatpush3.msra.mxu1 %v145_v51 }
  0x1b   :  { %91 = vmatpush1.msra.mxu0 %v28_v40  ;;  %269 = vmatprep.subr.mxu1 %v160_v53 }
  0x1c   :  { %92 = vmatprep.subr.mxu0 %v27_v42  ;;  %270 = vmatpush3.msra.mxu1 %v144_v55 }
  0x1d   :  { %93 = vmatpush1.msra.mxu0 %v26_v44  ;;  %271 = vmatprep.subr.mxu1 %v159_v56 }
  0x1e   :  { %94 = vmatprep.subr.mxu0 %v25_v46  ;;  %272 = vmatpush3.msra.mxu1 %v143_v57 }
  0x1f   :  { %95 = vmatpush1.msra.mxu0 %v24_v48  ;;  %273 = vmatprep.subr.mxu1 %v158_v58 }
  0x20   :  { %96 = vmatprep.subr.mxu0 %v23_v50  ;;  %274 = vmatpush3.msra.mxu1 %v142_v59 }
  0x21   :  { %97 = vmatpush1.msra.mxu0 %v22_v52  ;;  %275 = vmatprep.subr.mxu1 %v157_v60 }
  0x22   :  { %131 = vmatmul.mubr.f32.vlgmr.msra.gmra.mxu0 %v21_v54  ;;  %276 = vmatpush3.msra.mxu1 %v141_v61 }
  0x23   :  { %277 = vmatprep.subr.mxu1 %v156_v62 }
  0x24   :  { %278 = vmatpush3.msra.mxu1 %v140_v63 }
  0x25   :  { %279 = vmatprep.subr.mxu1 %v155_v0 }
  0x26   :  { %280 = vmatpush3.msra.mxu1 %v139_v1 }
  0xe2   :  { %v132_v9 = vpop.f32.mrf.mxu0 }
  0xe3   :  { %v133_v10 = vadd.f32 %v132_v9, %v59_v7 }
  0xe4   :  { %v134_v11 = vpop.f32.mrf.mxu0 }
  0xe5   :  { %v135_v12 = vadd.f32 %v134_v11, %v63_v8  ;;  %v137_v14 = vmax.f32 %v133_v10, 0.0 }
  0xe7   :  { %v138_v13 = vmax.f32 %v135_v12, 0.0 }
  0xe9   :  { %237 = vmatprep.mubr.f32.mxu1 %v138_v13 }
  0xea   :  { %238 = vmatmul.mubr.f32.vlgmr.msra.gmra.mxu1 %v137_v14 }
 0x1aa   :  { %v281_v15 = vpop.f32.mrf.mxu1 }
 0x1ac   :  { %v282_v17 = vpop.f32.mrf.mxu1 }
 0x1ad   :  { %v283_v18 = vadd.f32 %v282_v17, %v281_v15 }
 0x1af   :  { %v240_v19 = vadd.f32 %v283_v18, %v172_v16 }
 0x1b1   :  { %244 = vst.msk [vmem:[%s525_s5] sm:$0xff] %vm243_vm0, %v240_v19 }

</bundles_post_ra>
